<compile_context>
chip_gen: v7x
topology: tpu7x:2x2x1
jax: 0.10.0
libtpu: 0.0.40
codegen_flags: <defaults>
</compile_context>

<pallas_src>
import jax
import jax.numpy as jnp
from jax.experimental import pallas as pl
from jax.experimental.pallas import tpu as pltpu


def make_falayer_kernel(dropout_p: float, training: bool):
    apply_dropout = bool(training) and float(dropout_p) > 0.0
    inv_keep = 1.0 / (1.0 - float(dropout_p)) if apply_dropout else 1.0

    def kernel(hd_ref, hs_ref, a_ref, ddst_ref, dsrc_ref, wg_ref, gb_ref,
               seed_ref, z_ref):
        j = pl.program_id(1)

        @pl.when(j == 0)
        def _init():
            z_ref[...] = jnp.zeros_like(z_ref)

        h_dst = hd_ref[...]                                   # [TD, D]
        h_src = hs_ref[...]                                   # [TS, D]
        wg = wg_ref[...]                                      # [D, 2]: col0 = w_dst, col1 = w_src
        bias = gb_ref[0]

        # Per-node gate scores on the MXU.
        sc_dst = jnp.dot(h_dst, wg, preferred_element_type=jnp.float32)   # [TD, 2]
        sc_src = jnp.dot(h_src, wg, preferred_element_type=jnp.float32)   # [TS, 2]

        # Pairwise pre-activation s_dst[v] + s_src[u] + b as a K=2 rhs-transposed
        # matmul (outer-sum): no lane/sublane shuffles, MXU does the broadcast.
        ones_d = jnp.ones((h_dst.shape[0], 1), jnp.float32)
        ones_s = jnp.ones((h_src.shape[0], 1), jnp.float32)
        lhs = jnp.concatenate([sc_dst[:, 0:1] + bias, ones_d], axis=1)    # [TD, 2]
        rhs = jnp.concatenate([ones_s, sc_src[:, 1:2]], axis=1)           # [TS, 2]
        pre = jax.lax.dot_general(
            lhs, rhs, dimension_numbers=(((1,), (1,)), ((), ())),
            preferred_element_type=jnp.float32)                           # [TD, TS]

        tem_g = jnp.tanh(pre)                                             # EUP tanh
        e = tem_g * a_ref[...].astype(jnp.float32)                        # mask to edges

        if apply_dropout:
            # dropout(e): elementwise keep-mask * 1/(1-p); degree scaling commutes
            # with it, so hoisting d_dst / d_src below is exact.
            pltpu.prng_seed(seed_ref[0]
                            + pl.program_id(0) * pl.num_programs(1) + j)
            bits = pltpu.bitcast(pltpu.prng_random_bits(e.shape), jnp.uint32)
            u = (bits >> jnp.uint32(9)).astype(jnp.float32) * jnp.float32(1.0 / (1 << 23))
            e = jnp.where(u >= jnp.float32(dropout_p),
                          e * jnp.float32(inv_keep), jnp.float32(0.0))

        # Fold d_src into the source features once per tile ([TS, D] multiply,
        # much cheaper than scaling the [TD, TS] edge tile), then aggregate.
        h_src_scaled = h_src * dsrc_ref[...]                              # [TS, D]
        z_ref[...] += jnp.dot(e, h_src_scaled, preferred_element_type=jnp.float32)

        # Apply the d_dst factor once per dst block.
        @pl.when(j == pl.num_programs(1) - 1)
        def _finalize():
            z_ref[...] = z_ref[...] * ddst_ref[...]

    return kernel


def falayer_forward(h, adj, deg_norm, gate_w, gate_b, *,
                    dropout_p=0.0, training=False, seed=0, tile=128):
    """FALayer forward.

    h        : [N, D]    node features
    adj      : [N, N]    dense 0/1 adjacency, adj[v, u] = 1 iff edge u -> v
    deg_norm : [N]       node normalization (DGL g.ndata['d'], typically deg^-0.5)
    gate_w   : [1, 2*D]  gate Linear weight in PyTorch layout ([w_dst | w_src])
    gate_b   : scalar    gate Linear bias
    """
    N, D = h.shape
    # TODO(synk): for large graphs with N % 128 != 0, pad N (and the mask/deg_norm)
    #             to a multiple of 128 instead of falling back to whole-graph blocks.
    T = tile if (N % tile == 0) else N
    nb = N // T

    h32 = h.astype(jnp.float32)
    adj_mask = adj.astype(jnp.bfloat16)          # exact for a 0/1 mask, halves traffic
    d_col = jnp.reshape(deg_norm, (N, 1)).astype(jnp.float32)
    wg = jnp.stack([gate_w[0, :D], gate_w[0, D:]], axis=1).astype(jnp.float32)  # [D, 2]
    gb = jnp.reshape(jnp.asarray(gate_b, jnp.float32), (1,))
    seed_arr = jnp.asarray([seed], jnp.int32)

    kernel = make_falayer_kernel(float(dropout_p), bool(training))
    smem = pl.BlockSpec(memory_space=pltpu.MemorySpace.SMEM)

    return pl.pallas_call(
        kernel,
        out_shape=jax.ShapeDtypeStruct((N, D), jnp.float32),
        grid=(nb, nb),
        in_specs=[
            pl.BlockSpec((T, D), lambda i, j: (i, 0)),   # h, dst rows
            pl.BlockSpec((T, D), lambda i, j: (j, 0)),   # h, src rows
            pl.BlockSpec((T, T), lambda i, j: (i, j)),   # adjacency tile (bf16 mask)
            pl.BlockSpec((T, 1), lambda i, j: (i, 0)),   # d for dst rows
            pl.BlockSpec((T, 1), lambda i, j: (j, 0)),   # d for src rows
            pl.BlockSpec((D, 2), lambda i, j: (0, 0)),   # gate weight [w_dst | w_src]
            smem,                                        # gate bias
            smem,                                        # dropout PRNG seed
        ],
        out_specs=pl.BlockSpec((T, D), lambda i, j: (i, 0)),
        compiler_params=pltpu.CompilerParams(
            dimension_semantics=("parallel", "arbitrary")),
    )(h32, h32, adj_mask, d_col, d_col, wg, gb, seed_arr)


def falayer_reference(h, adj, deg_norm, gate_w, gate_b):
    """Pure-JAX reference of the dense FALayer forward (eval mode)."""
    D = h.shape[1]
    s_dst = h @ gate_w[0, :D]
    s_src = h @ gate_w[0, D:]
    tem_g = jnp.tanh(s_dst[:, None] + s_src[None, :] + gate_b)
    e = tem_g * deg_norm[:, None] * deg_norm[None, :] * adj
    return e @ h


if __name__ == "__main__":
    key = jax.random.PRNGKey(0)
    N, D = 256, 32                       # nodes, in_dim
    k_h, k_a, k_w, k_b = jax.random.split(key, 4)

    h = jax.random.normal(k_h, (N, D), jnp.float32)

    # Random undirected graph (~5% density), no self loops.
    upper = jnp.triu((jax.random.uniform(k_a, (N, N)) < 0.05).astype(jnp.float32), k=1)
    adj = upper + upper.T                                     # adj[v, u] == adj[u, v]

    # Mirrors FAGCN's g.ndata['d'] = in_degree.clamp(min=1) ** -0.5 (set outside FALayer).
    deg = jnp.maximum(jnp.sum(adj, axis=1), 1.0)
    deg_norm = jax.lax.rsqrt(deg)

    # gate = nn.Linear(2*D, 1); xavier_normal_(weight, gain=1.414); default bias init.
    gain = 1.414
    std = gain * (2.0 / (2 * D + 1)) ** 0.5
    gate_w = std * jax.random.normal(k_w, (1, 2 * D), jnp.float32)
    bound = 1.0 / (2 * D) ** 0.5
    gate_b = jax.random.uniform(k_b, (), jnp.float32, -bound, bound)

    # Eval mode (dropout is identity) so the result is deterministic and checkable.
    z = falayer_forward(h, adj, deg_norm, gate_w, gate_b,
                        dropout_p=0.5, training=False, seed=0)
    jax.block_until_ready(z)

    z_ref = falayer_reference(h, adj, deg_norm, gate_w, gate_b)
    max_err = float(jnp.max(jnp.abs(z - z_ref)))
    assert z.shape == (N, D)
    assert bool(jnp.all(jnp.isfinite(z)))
    assert max_err < 5e-2, f"max abs error vs reference: {max_err}"
    print("KERNEL_OK")
</pallas_src>

<mosaic_0001>
module attributes {stable_mosaic.version = 11 : i64} {
  func.func @kernel(%arg0: i32, %arg1: i32, %arg2: memref<128x32xf32, #tpu.memory_space<vmem>>, %arg3: memref<128x32xf32, #tpu.memory_space<vmem>>, %arg4: memref<128x128xbf16, #tpu.memory_space<vmem>>, %arg5: memref<128x1xf32, #tpu.memory_space<vmem>>, %arg6: memref<128x1xf32, #tpu.memory_space<vmem>>, %arg7: memref<32x2xf32, #tpu.memory_space<vmem>>, %arg8: memref<1xf32, #tpu.memory_space<smem>>, %arg9: memref<1xi32, #tpu.memory_space<smem>>, %arg10: memref<128x32xf32, #tpu.memory_space<vmem>>) attributes {dimension_semantics = [#tpu.dimension_semantics<parallel>, #tpu.dimension_semantics<arbitrary>], iteration_bounds = array<i64: 2, 2>, scalar_prefetch = 0 : i64, scratch_operands = 0 : i64, tpu.core_type = #tpu.core_type<tc>, window_params = [{transform_indices = @transform_0, window_bounds = array<i64: 128, 32>}, {transform_indices = @transform_1, window_bounds = array<i64: 128, 32>}, {transform_indices = @transform_2, window_bounds = array<i64: 128, 128>}, {transform_indices = @transform_3, window_bounds = array<i64: 128, 1>}, {transform_indices = @transform_4, window_bounds = array<i64: 128, 1>}, {pipeline_mode = #tpu.pipeline_mode<synchronous>, transform_indices = @transform_5, window_bounds = array<i64: 32, 2>}, {transform_indices = @transform_6, window_bounds = array<i64: 1>}, {transform_indices = @transform_7, window_bounds = array<i64: 1>}, {transform_indices = @transform_8, window_bounds = array<i64: 128, 32>}]} {
    %c0_i32 = arith.constant 0 : i32
    %0 = arith.cmpi eq, %arg1, %c0_i32 : i32
    %1 = arith.extui %0 : i1 to i32
    %c0_i32_0 = arith.constant 0 : i32
    %2 = arith.cmpi ne, %1, %c0_i32_0 : i32
    scf.if %2 {
      %cst_21 = arith.constant 0.000000e+00 : f32
      %32 = vector.broadcast %cst_21 : f32 to vector<128x32xf32>
      %c0_22 = arith.constant 0 : index
      %c0_23 = arith.constant 0 : index
      %33 = vector.load %arg10[%c0_22, %c0_23] : memref<128x32xf32, #tpu.memory_space<vmem>>, vector<128x32xf32>
      tpu.vector_store %arg10[%c0_22, %c0_23], %32 {strides = array<i32>} : memref<128x32xf32, #tpu.memory_space<vmem>>, vector<128x32xf32>,
    } else {
    }
    %c0 = arith.constant 0 : index
    %c0_1 = arith.constant 0 : index
    %3 = vector.load %arg2[%c0, %c0_1] : memref<128x32xf32, #tpu.memory_space<vmem>>, vector<128x32xf32>
    %c0_2 = arith.constant 0 : index
    %c0_3 = arith.constant 0 : index
    %4 = vector.load %arg3[%c0_2, %c0_3] : memref<128x32xf32, #tpu.memory_space<vmem>>, vector<128x32xf32>
    %c0_4 = arith.constant 0 : index
    %c0_5 = arith.constant 0 : index
    %5 = vector.load %arg7[%c0_4, %c0_5] : memref<32x2xf32, #tpu.memory_space<vmem>>, vector<32x2xf32>
    %c0_6 = arith.constant 0 : index
    %6 = memref.load %arg8[%c0_6] : memref<1xf32, #tpu.memory_space<smem>>
    %cst = arith.constant dense<0.000000e+00> : vector<128x2xf32>
    %7 = tpu.matmul %3, %5, %cst {dimension_numbers = #tpu.dot_dimension_numbers<[1], [0], [0], [1], [0, 0, 1, 1], [], []>} : vector<128x32xf32>, vector<32x2xf32>, vector<128x2xf32> -> vector<128x2xf32>
    %cst_7 = arith.constant dense<0.000000e+00> : vector<128x2xf32>
    %8 = tpu.matmul %4, %5, %cst_7 {dimension_numbers = #tpu.dot_dimension_numbers<[1], [0], [0], [1], [0, 0, 1, 1], [], []>} : vector<128x32xf32>, vector<32x2xf32>, vector<128x2xf32> -> vector<128x2xf32>
    %cst_8 = arith.constant 1.000000e+00 : f32
    %9 = vector.broadcast %cst_8 : f32 to vector<128x1xf32>
    %cst_9 = arith.constant 1.000000e+00 : f32
    %10 = vector.broadcast %cst_9 : f32 to vector<128x1xf32>
    %11 = vector.extract_strided_slice %7 {offsets = [0, 0], sizes = [128, 1], strides = [1, 1]} : vector<128x2xf32> to vector<128x1xf32>
    %12 = vector.broadcast %6 : f32 to vector<128x1xf32>
    %13 = arith.addf %11, %12 : vector<128x1xf32>
    %14 = tpu.concatenate %13, %9 in 1 : vector<128x1xf32>, vector<128x1xf32> -> vector<128x2xf32>
    %15 = vector.extract_strided_slice %8 {offsets = [0, 1], sizes = [128, 1], strides = [1, 1]} : vector<128x2xf32> to vector<128x1xf32>
    %16 = tpu.concatenate %10, %15 in 1 : vector<128x1xf32>, vector<128x1xf32> -> vector<128x2xf32>
    %cst_10 = arith.constant dense<0.000000e+00> : vector<128x128xf32>
    %17 = tpu.matmul %14, %16, %cst_10 {dimension_numbers = #tpu.dot_dimension_numbers<[1], [1], [0], [0], [0, 0, 1, 0], [], []>} : vector<128x2xf32>, vector<128x2xf32>, vector<128x128xf32> -> vector<128x128xf32>
    %18 = math.tanh %17 : vector<128x128xf32>
    %c0_11 = arith.constant 0 : index
    %c0_12 = arith.constant 0 : index
    %19 = vector.load %arg4[%c0_11, %c0_12] : memref<128x128xbf16, #tpu.memory_space<vmem>>, vector<128x128xbf16>
    %20 = arith.extf %19 : vector<128x128xbf16> to vector<128x128xf32>
    %21 = arith.mulf %18, %20 : vector<128x128xf32>
    %c0_13 = arith.constant 0 : index
    %c0_14 = arith.constant 0 : index
    %22 = vector.load %arg6[%c0_13, %c0_14] : memref<128x1xf32, #tpu.memory_space<vmem>>, vector<128x1xf32>
    %23 = vector.broadcast %22 : vector<128x1xf32> to vector<128x32xf32>
    %24 = arith.mulf %4, %23 : vector<128x32xf32>
    %c0_15 = arith.constant 0 : index
    %c0_16 = arith.constant 0 : index
    %25 = vector.load %arg10[%c0_15, %c0_16] : memref<128x32xf32, #tpu.memory_space<vmem>>, vector<128x32xf32>
    %cst_17 = arith.constant dense<0.000000e+00> : vector<128x32xf32>
    %26 = tpu.matmul %21, %24, %cst_17 {dimension_numbers = #tpu.dot_dimension_numbers<[1], [0], [0], [1], [0, 0, 1, 1], [], []>} : vector<128x128xf32>, vector<128x32xf32>, vector<128x32xf32> -> vector<128x32xf32>
    %27 = arith.addf %25, %26 : vector<128x32xf32>
    %c0_18 = arith.constant 0 : index
    %c0_19 = arith.constant 0 : index
    %28 = vector.load %arg10[%c0_18, %c0_19] : memref<128x32xf32, #tpu.memory_space<vmem>>, vector<128x32xf32>
    tpu.vector_store %arg10[%c0_18, %c0_19], %27 {strides = array<i32>} : memref<128x32xf32, #tpu.memory_space<vmem>>, vector<128x32xf32>,
    %c1_i32 = arith.constant 1 : i32
    %29 = arith.cmpi eq, %arg1, %c1_i32 : i32
    %30 = arith.extui %29 : i1 to i32
    %c0_i32_20 = arith.constant 0 : i32
    %31 = arith.cmpi ne, %30, %c0_i32_20 : i32
    scf.if %31 {
      %c0_21 = arith.constant 0 : index
      %c0_22 = arith.constant 0 : index
      %32 = vector.load %arg10[%c0_21, %c0_22] : memref<128x32xf32, #tpu.memory_space<vmem>>, vector<128x32xf32>
      %c0_23 = arith.constant 0 : index
      %c0_24 = arith.constant 0 : index
      %33 = vector.load %arg5[%c0_23, %c0_24] : memref<128x1xf32, #tpu.memory_space<vmem>>, vector<128x1xf32>
      %34 = vector.broadcast %33 : vector<128x1xf32> to vector<128x32xf32>
      %35 = arith.mulf %32, %34 : vector<128x32xf32>
      %c0_25 = arith.constant 0 : index
      %c0_26 = arith.constant 0 : index
      %36 = vector.load %arg10[%c0_25, %c0_26] : memref<128x32xf32, #tpu.memory_space<vmem>>, vector<128x32xf32>
      tpu.vector_store %arg10[%c0_25, %c0_26], %35 {strides = array<i32>} : memref<128x32xf32, #tpu.memory_space<vmem>>, vector<128x32xf32>,
    } else {
    }
    return
  }
  func.func @transform_0(%arg0: i32, %arg1: i32) -> (i32, i32) {
    %c0_i32 = arith.constant 0 : i32
    %c0_i32_0 = arith.constant 0 : i32
    return %arg0, %c0_i32 : i32, i32
  }
  func.func @transform_1(%arg0: i32, %arg1: i32) -> (i32, i32) {
    %c0_i32 = arith.constant 0 : i32
    %c0_i32_0 = arith.constant 0 : i32
    return %arg1, %c0_i32 : i32, i32
  }
  func.func @transform_2(%arg0: i32, %arg1: i32) -> (i32, i32) {
    %c0_i32 = arith.constant 0 : i32
    return %arg0, %arg1 : i32, i32
  }
  func.func @transform_3(%arg0: i32, %arg1: i32) -> (i32, i32) {
    %c0_i32 = arith.constant 0 : i32
    %c0_i32_0 = arith.constant 0 : i32
    return %arg0, %c0_i32 : i32, i32
  }
  func.func @transform_4(%arg0: i32, %arg1: i32) -> (i32, i32) {
    %c0_i32 = arith.constant 0 : i32
    %c0_i32_0 = arith.constant 0 : i32
    return %arg1, %c0_i32 : i32, i32
  }
  func.func @transform_5(%arg0: i32, %arg1: i32) -> (i32, i32) {
    %c0_i32 = arith.constant 0 : i32
    %c0_i32_0 = arith.constant 0 : i32
    %c0_i32_1 = arith.constant 0 : i32
    return %c0_i32, %c0_i32_0 : i32, i32
  }
  func.func @transform_6(%arg0: i32, %arg1: i32) -> i32 {
    %c0_i32 = arith.constant 0 : i32
    %c0_i32_0 = arith.constant 0 : i32
    return %c0_i32 : i32
  }
  func.func @transform_7(%arg0: i32, %arg1: i32) -> i32 {
    %c0_i32 = arith.constant 0 : i32
    %c0_i32_0 = arith.constant 0 : i32
    return %c0_i32 : i32
  }
  func.func @transform_8(%arg0: i32, %arg1: i32) -> (i32, i32) {
    %c0_i32 = arith.constant 0 : i32
    %c0_i32_0 = arith.constant 0 : i32
    return %arg0, %c0_i32 : i32, i32
  }
}

</mosaic_0001>

<bundles_post_ra>
// kernel: tpu_custom_call.1
= control target key start
LH: loop header
LB: loop body
LE: loop exit
PB: predicated region body
PF: predicated region fallthrough
CT: control target
= control target key end

     0   :  { %s3163_s0 = inlined_call_operand.vmem [shape: f32[256,32], index: 0, kind: input, shape index: {}]   ;;  %s3164_s1 = inlined_call_operand.vmem [shape: f32[256,32], index: 1, kind: input, shape index: {}]   ;;  %s3165_s2 = inlined_call_operand.vmem [shape: bf16[256,256], index: 2, kind: input, shape index: {}]   ;;  %s3166_s3 = inlined_call_operand.vmem [shape: f32[256,1], index: 3, kind: input, shape index: {}]   ;;  %s3167_s4 = inlined_call_operand.vmem [shape: f32[256,1], index: 4, kind: input, shape index: {}]   ;;  %s3168_s5 = inlined_call_operand.vmem [shape: f32[32,2], index: 5, kind: input, shape index: {}]   ;;  %s3169_s6 = inlined_call_operand.<no memory space> [shape: f32[1], index: 6, kind: input, shape index: {}]   ;;  %s3170_s7 = inlined_call_operand.<no memory space> [shape: s32[1], index: 7, kind: input, shape index: {}]   ;;  %s3171_s8 = inlined_call_operand.vmem [shape: f32[256,32], index: 8, kind: output, shape index: {}]  }
   0x1   :  { %3172 = sst [smem:[#allocation5_spill]] %s3163_s0 }
   0x2   :  { %13 = sst [smem:[#allocation2]] %s3169_s6 }
   0x3   :  { %s2600_s29 = smov 0   ;;  %s2602_s30 = smov 0  }
   0x4   :  { %s2604_s9 = smov 0   ;;  %s2606_s10 = smov 0  }
   0x5   :  { %s2608_s11 = smov 0   ;;  %s2610_s12 = smov 0  }
   0x6   :  { %s2612_s7 = smov 0  }
   0x7 LB: > { %s29_s6 = sadd.s32 1, %s2539_s11  ;;  %s32_s13 = sadd.s32 1, %s2543_s12  ;;  %s2547_s7 = sphi %s2612_s7, %s20_s7   ;;  %s2543_s12 = sphi %s2610_s12, %s3181_s12   ;;  %s2539_s11 = sphi %s2608_s11, %s3180_s11   ;;  %s2535_s10 = sphi %s2606_s10, %s3179_s10   ;;  %s2531_s9 = sphi %s2604_s9, %s3178_s9   ;;  %s2527_s30 = sphi %s2602_s30, %s3177_s30   ;;  %s2523_s29 = sphi %s2600_s29, %s3176_s29  }
   0x8   : > { %p30_p0 = scmp.ge.s32.totalorder %s29_s6, 2  ;;  %p100_p1 = scmp.ne.s32.totalorder %s2527_s30, %s2523_s29 }
   0x9   : > { %p101_p2 = scmp.eq.s32.totalorder %s2547_s7, 0  ;;  %s93_s17 = sadd.s32 1, %s2527_s30 }
   0xa   : > { %s3183_s6 = smov (%p30_p0, %s29_s6), 0  ;;  %s3185_s13 = smov (!%p30_p0, %s32_s13), %s2543_s12 }
   0xb   : > { %p102_p3 = por %p101_p2, %p100_p1  ;;  %p34_p4 = scmp.ge.s32.totalorder %s3185_s13, 2 }
   0xc   : > { %s89_s14 = ssub.s32 %s2539_s11, %s3183_s6  ;;  %p1897_p6 = scmp.ge.s32.totalorder %s2547_s7, 4 }
   0xd   : > { %s3187_s13 = smov (%p34_p4, %s3185_s13), 0 }
   0xe   : > { %s88_s15 = ssub.s32 %s2543_s12, %s3187_s13  ;;  %276 = sbr.rel (%p1897_p6) target bundleno = 37 (0x25), region = 28 }
   0xf   : > { %s90_s16 = sor.u32 %s89_s14, %s88_s15 }
  0x10   : > { %p91_p5 = scmp.eq.s32.totalorder %s90_s16, 0 }
  0x12   : > { %s2651_s18 = scalar_select %p91_p5, %s2527_s30, %s93_s17  }
  0x15   : > { %297 = sbr.rel (!%p102_p3) target bundleno = 37 (0x25), region = 40  ;;  %s299_s19 = sand.u32 (%p102_p3), 1, %s2527_s30  }
  0x16   : > { %s1982_s20 = sshll.u32 (%p102_p3), %s2543_s12, 5  ;;  %s1898_s21 = sshll.u32 (%p102_p3), %s299_s19, 6 }
  0x17   : > { %s304_s22 = sadd.s32 (%p102_p3), %s2539_s11, %s1982_s20  ;;  %s301_s27 = scalar_lea.vmem (%p102_p3), [#allocation4], %s1898_s21 }
  0x18   : > { %s1901_s23 = sshll.u32 (%p102_p3), %s304_s22, 2 }
  0x19   : > { %s2660_s26 = scalar_lea.vmem (%p102_p3), %s3165_s2, %s1901_s23 }
  0x1a   : > { %v322_v0 = vld [vmem:[%s2660_s26] sm:$0xf] (%p102_p3)  ;;  %v324_v1 = vld [vmem:[%s2660_s26 + $0x8] sm:$0xf] (%p102_p3)  ;;  %v326_v2 = vld [vmem:[%s2660_s26 + $0x10] sm:$0xf] (%p102_p3) }
  0x1b   : > { %323 = vst [vmem:[%s301_s27] sm:$0xf] (%p102_p3), %v322_v0  ;;  %325 = vst [vmem:[%s301_s27 + $0x4] sm:$0xf] (%p102_p3), %v324_v1  ;;  %v328_v3 = vld [vmem:[%s2660_s26 + $0x18] sm:$0xf] (%p102_p3) }
  0x1c   : > { %327 = vst [vmem:[%s301_s27 + $0x8] sm:$0xf] %v326_v2  ;;  %v330_v4 = vld [vmem:[%s2660_s26 + $0x20] sm:$0xf]  ;;  %v332_v5 = vld [vmem:[%s2660_s26 + $0x28] sm:$0xf] }
  0x1d   : > { %329 = vst [vmem:[%s301_s27 + $0xc] sm:$0xf] %v328_v3  ;;  %331 = vst [vmem:[%s301_s27 + $0x10] sm:$0xf] %v330_v4  ;;  %v334_v6 = vld [vmem:[%s2660_s26 + $0x30] sm:$0xf] }
  0x1e   : > { %333 = vst [vmem:[%s301_s27 + $0x14] sm:$0xf] %v332_v5  ;;  %v336_v7 = vld [vmem:[%s2660_s26 + $0x38] sm:$0xf]  ;;  %v338_v8 = vld [vmem:[%s2660_s26 + $0x40] sm:$0xf] }
  0x1f   : > { %335 = vst [vmem:[%s301_s27 + $0x18] sm:$0xf] %v334_v6  ;;  %337 = vst [vmem:[%s301_s27 + $0x1c] sm:$0xf] %v336_v7  ;;  %v340_v9 = vld [vmem:[%s2660_s26 + $0x48] sm:$0xf] }
  0x20   : > { %339 = vst [vmem:[%s301_s27 + $0x20] sm:$0xf] %v338_v8  ;;  %v342_v10 = vld [vmem:[%s2660_s26 + $0x50] sm:$0xf]  ;;  %v344_v11 = vld [vmem:[%s2660_s26 + $0x58] sm:$0xf] }
  0x21   : > { %341 = vst [vmem:[%s301_s27 + $0x24] sm:$0xf] %v340_v9  ;;  %343 = vst [vmem:[%s301_s27 + $0x28] sm:$0xf] %v342_v10  ;;  %v346_v12 = vld [vmem:[%s2660_s26 + $0x60] sm:$0xf] }
  0x22   : > { %345 = vst [vmem:[%s301_s27 + $0x2c] sm:$0xf] %v344_v11  ;;  %v348_v13 = vld [vmem:[%s2660_s26 + $0x68] sm:$0xf]  ;;  %v350_v14 = vld [vmem:[%s2660_s26 + $0x70] sm:$0xf] }
  0x23   : > { %347 = vst [vmem:[%s301_s27 + $0x30] sm:$0xf] %v346_v12  ;;  %349 = vst [vmem:[%s301_s27 + $0x34] sm:$0xf] %v348_v13  ;;  %v352_v15 = vld [vmem:[%s2660_s26 + $0x78] sm:$0xf] }
  0x24   : > { %351 = vst [vmem:[%s301_s27 + $0x38] sm:$0xf] %v350_v14  ;;  %353 = vst [vmem:[%s301_s27 + $0x3c] sm:$0xf] %v352_v15 }
  0x25 PF: > { %p1902_p7 = scmp.ge.s32.totalorder %s2547_s7, 1  ;;  %p425_p8 = scmp.lt.s32.totalorder %s2547_s7, 5 }
  0x27   : > { %p426_p9 = pnand %p1902_p7, %p425_p8 }
  0x28   : > { %s432_s28 = sand.u32 (!%p426_p9), 1, %s2523_s29   ;;  %s1904_s14 = sshll.u32 (!%p426_p9), %s2535_s10, 4 }
  0x29   : > { %429 = sbr.rel (%p426_p9) target bundleno = 922 (0x39a), region = 89  ;;  %s1903_s15 = sshll.u32 (!%p426_p9), %s432_s28, 6 }
  0x2a   : > { %p486_p10 = scmp.lt.s32.totalorder (!%p426_p9), %s1904_s14, 31  ;;  %s1906_s16 = sshll.u32 (!%p426_p9), %s2531_s9, 4 }
  0x2b   : > { %p492_p11 = scmp.lt.s32.totalorder (!%p426_p9), %s1906_s16, 31  ;;  %s3173_s0 = sld [smem:[#allocation5_spill]] (!%p426_p9) }
  0x2c   : > { %s2708_s22 = scalar_lea.vmem (!%p426_p9), [#allocation4], %s1903_s15  ;;  %p1914_p12 = scmp.ne.s32.totalorder (!%p426_p9), %s2531_s9, 0 }
  0x30   : > { %s3189_s14 = smov (!%p486_p10, %s1904_s14), 31  ;;  %s3191_s16 = smov (!%p492_p11, %s1906_s16), 31 }
  0x31   : > { %s1905_s17 = sshll.u32 %s3189_s14, 3  ;;  %s1907_s26 = sshll.u32 %s3191_s16, 3  ;;  %vm520_vm0 = vcmask (!%p1914_p12), 261120   ;;  %v2549_v16 = vmov (!%p1914_p12), 0.0  }
  0x32   : > { %s2686_s21 = scalar_lea.vmem %s3173_s0, %s1905_s17  ;;  %s2691_s24 = scalar_lea.vmem %s3166_s3, %s1905_s17 }
  0x33   : > { %s2696_s10 = scalar_lea.vmem %s3171_s8, %s1905_s17  ;;  %s2701_s14 = scalar_lea.vmem %s3164_s1, %s1907_s26 }
  0x34   : > { %s2706_s0 = scalar_lea.vmem %s3167_s4, %s1907_s26  ;;  %519 = sbr.rel (%p1914_p12) target bundleno = 60 (0x3c), region = 97  ;;  %521 = vst.msk [vmem:[%s2696_s10] sm:$0xff] (!%p1914_p12), %vm520_vm0, %v2549_v16  ;;  %522 = vst.msk [vmem:[%s2696_s10 + $0x8] sm:$0xff] (!%p1914_p12), %vm520_vm0, %v2549_v16 }
  0x35   : > { %523 = vst.msk [vmem:[%s2696_s10 + $0x10] sm:$0xff] (!%p1914_p12), %vm520_vm0, %v2549_v16  ;;  %524 = vst.msk [vmem:[%s2696_s10 + $0x18] sm:$0xff] (!%p1914_p12), %vm520_vm0, %v2549_v16 }
  0x36   : > { %525 = vst.msk [vmem:[%s2696_s10 + $0x20] sm:$0xff] (!%p1914_p12), %vm520_vm0, %v2549_v16  ;;  %526 = vst.msk [vmem:[%s2696_s10 + $0x28] sm:$0xff] (!%p1914_p12), %vm520_vm0, %v2549_v16 }
  0x37   : > { %527 = vst.msk [vmem:[%s2696_s10 + $0x30] sm:$0xff] (!%p1914_p12), %vm520_vm0, %v2549_v16  ;;  %528 = vst.msk [vmem:[%s2696_s10 + $0x38] sm:$0xff] (!%p1914_p12), %vm520_vm0, %v2549_v16 }
  0x38   : > { %529 = vst.msk [vmem:[%s2696_s10 + $0x40] sm:$0xff] (!%p1914_p12), %vm520_vm0, %v2549_v16  ;;  %530 = vst.msk [vmem:[%s2696_s10 + $0x48] sm:$0xff] (!%p1914_p12), %vm520_vm0, %v2549_v16 }
  0x39   : > { %531 = vst.msk [vmem:[%s2696_s10 + $0x50] sm:$0xff] (!%p1914_p12), %vm520_vm0, %v2549_v16  ;;  %532 = vst.msk [vmem:[%s2696_s10 + $0x58] sm:$0xff] (!%p1914_p12), %vm520_vm0, %v2549_v16 }
  0x3a   : > { %533 = vst.msk [vmem:[%s2696_s10 + $0x60] sm:$0xff] (!%p1914_p12), %vm520_vm0, %v2549_v16  ;;  %534 = vst.msk [vmem:[%s2696_s10 + $0x68] sm:$0xff] (!%p1914_p12), %vm520_vm0, %v2549_v16 }
  0x3b   : > { %535 = vst.msk [vmem:[%s2696_s10 + $0x70] sm:$0xff] %vm520_vm0, %v2549_v16  ;;  %536 = vst.msk [vmem:[%s2696_s10 + $0x78] sm:$0xff] %vm520_vm0, %v2549_v16 }
  0x3c PF: > { %v569_v17 = vld [vmem:[%s3168_s5] sm:$0xff]  ;;  %v570_v18 = vld [vmem:[%s3168_s5 + $0x8] sm:$0xff]  ;;  %v571_v19 = vld [vmem:[%s3168_s5 + $0x10] sm:$0xff]  ;;  %vm574_vm1 = vcmask 261120   ;;  %v2550_v55 = vmov 0   ;;  %vm978_vm2 = vcmask 7168  }
  0x3d   : > { %v2302_v20 = vpack.c.bf16 %v570_v18, %v569_v17  ;;  %v572_v21 = vld [vmem:[%s3168_s5 + $0x18] sm:$0xff]  ;;  %v2756_v22 = vld [vmem:[%s2701_s14] sm:$0xff]  ;;  %v2763_v25 = vld [vmem:[%s2701_s14 + $0x8] sm:$0xff]  ;;  %2457 = vset.pattern.permute.xlu0 %v2550_v55  ;;  %2458 = vset.pattern.permute.xlu1 %v2550_v55  ;;  %vm1011_vm3 = vcmask 15360   ;;  %p1979_p13 = scmp.ne.s32.totalorder %s2531_s9, 1 }
  0x3e   : > { %v2306_v23 = vpack.c.bf16 %v572_v21, %v571_v19  ;;  %2166 = vmatprep.mubr.msk.f32.mxu1 %vm574_vm1, %v2756_v22  ;;  %v537_v24 = vld [vmem:[%s2686_s21] sm:$0xff]  ;;  %v538_v26 = vld [vmem:[%s2686_s21 + $0x8] sm:$0xff]  ;;  %v2767_v27 = vld [vmem:[%s2701_s14 + $0x10] sm:$0xff] }
  0x3f   : > { %2311 = vmatprep.subr.bf16.mxu1 %v2302_v20  ;;  %2303 = vmatprep.subr.bf16.mxu0 %v2302_v20  ;;  %v539_v28 = vld [vmem:[%s2686_s21 + $0x10] sm:$0xff]  ;;  %v2776_v29 = vld [vmem:[%s2701_s14 + $0x18] sm:$0xff]  ;;  %v2781_v31 = vld [vmem:[%s2701_s14 + $0x20] sm:$0xff] }
  0x40   : > { %2313 = vmatpush3.bf16.msra.mxu1 %v2302_v20  ;;  %2305 = vmatpush3.bf16.msra.mxu0 %v2302_v20  ;;  %v540_v30 = vld [vmem:[%s2686_s21 + $0x18] sm:$0xff]  ;;  %v541_v32 = vld [vmem:[%s2686_s21 + $0x20] sm:$0xff]  ;;  %v2790_v33 = vld [vmem:[%s2701_s14 + $0x28] sm:$0xff] }
  0x41   : > { %2315 = vmatprep.subr.bf16.mxu1 %v2306_v23  ;;  %2307 = vmatprep.subr.bf16.mxu0 %v2306_v23  ;;  %v542_v34 = vld [vmem:[%s2686_s21 + $0x28] sm:$0xff]  ;;  %v2795_v35 = vld [vmem:[%s2701_s14 + $0x30] sm:$0xff]  ;;  %v2804_v37 = vld [vmem:[%s2701_s14 + $0x38] sm:$0xff] }
  0x42   : > { %2134 = vmatprep.mubr.msk.f32.mxu0 %vm574_vm1, %v537_v24  ;;  %v543_v36 = vld [vmem:[%s2686_s21 + $0x30] sm:$0xff]  ;;  %v544_v38 = vld [vmem:[%s2686_s21 + $0x38] sm:$0xff]  ;;  %v2809_v39 = vld [vmem:[%s2701_s14 + $0x40] sm:$0xff] }
  0x43   : > { %v545_v40 = vld [vmem:[%s2686_s21 + $0x40] sm:$0xff]  ;;  %v2818_v41 = vld [vmem:[%s2701_s14 + $0x48] sm:$0xff]  ;;  %v2823_v43 = vld [vmem:[%s2701_s14 + $0x50] sm:$0xff] }
  0x44   : > { %2317 = vmatpush3.bf16.msra.mxu1 %v2306_v23  ;;  %2309 = vmatpush3.bf16.msra.mxu0 %v2306_v23  ;;  %v546_v42 = vld [vmem:[%s2686_s21 + $0x48] sm:$0xff]  ;;  %v547_v44 = vld [vmem:[%s2686_s21 + $0x50] sm:$0xff]  ;;  %v2832_v45 = vld [vmem:[%s2701_s14 + $0x58] sm:$0xff] }
  0x45   : > { %v548_v46 = vld [vmem:[%s2686_s21 + $0x58] sm:$0xff]  ;;  %v2837_v47 = vld [vmem:[%s2701_s14 + $0x60] sm:$0xff]  ;;  %v2846_v49 = vld [vmem:[%s2701_s14 + $0x68] sm:$0xff] }
  0x46   : > { %v549_v48 = vld [vmem:[%s2686_s21 + $0x60] sm:$0xff]  ;;  %v550_v50 = vld [vmem:[%s2686_s21 + $0x68] sm:$0xff]  ;;  %v2851_v51 = vld [vmem:[%s2701_s14 + $0x70] sm:$0xff] }
  0x47   : > { %2167 = vmatmul.mubr.msk.f32.vlgmr.msra.gmra.mrb[0].mxu1 %vm574_vm1, %v2763_v25  ;;  %2135 = vmatmul.mubr.msk.f32.vlgmr.msra.gmra.mrb[0].mxu0 %vm574_vm1, %v538_v26  ;;  %v551_v52 = vld [vmem:[%s2686_s21 + $0x70] sm:$0xff]  ;;  %v2860_v53 = vld [vmem:[%s2701_s14 + $0x78] sm:$0xff]  ;;  %v1317_v56 = vld [vmem:[%s2706_s0] sm:$0xff] }
  0x48   : > { %2169 = vmatprep.mubr.msk.f32.mxu1 %vm574_vm1, %v2767_v27  ;;  %2137 = vmatprep.mubr.msk.f32.mxu0 %vm574_vm1, %v539_v28  ;;  %v552_v54 = vld [vmem:[%s2686_s21 + $0x78] sm:$0xff]  ;;  %v1319_v57 = vld [vmem:[%s2706_s0 + $0x10] sm:$0xff]  ;;  %v1318_v58 = vld [vmem:[%s2706_s0 + $0x8] sm:$0xff]  ;;  %s573_s21 = sld [smem:[#allocation2]] }
  0x49   : > { %1335 = vperm.xlu0 %2457, %v1317_v56   ;;  %1345 = vperm.xlu1 %2458, %v1319_v57   ;;  %v1320_v59 = vld [vmem:[%s2706_s0 + $0x18] sm:$0xff]  ;;  %v1321_v60 = vld [vmem:[%s2706_s0 + $0x20] sm:$0xff]  ;;  %v1322_v61 = vld [vmem:[%s2706_s0 + $0x28] sm:$0xff] }
  0x4a   : > { %v1323_v62 = vld [vmem:[%s2706_s0 + $0x30] sm:$0xff]  ;;  %v1324_v63 = vld [vmem:[%s2706_s0 + $0x38] sm:$0xff]  ;;  %v1325_v0 = vld [vmem:[%s2706_s0 + $0x40] sm:$0xff] }
  0x4b   : > { %2170 = vmatmul.mubr.msk.f32.gmra.mrb[2].mxu1 %vm574_vm1, %v2776_v29  ;;  %2138 = vmatmul.mubr.msk.f32.gmra.mrb[2].mxu0 %vm574_vm1, %v540_v30  ;;  %v1326_v1 = vld [vmem:[%s2706_s0 + $0x48] sm:$0xff]  ;;  %v1327_v2 = vld [vmem:[%s2706_s0 + $0x50] sm:$0xff]  ;;  %v1328_v3 = vld [vmem:[%s2706_s0 + $0x58] sm:$0xff] }
  0x4c   : > { %2172 = vmatprep.mubr.msk.f32.mxu1 %vm574_vm1, %v2781_v31  ;;  %2140 = vmatprep.mubr.msk.f32.mxu0 %vm574_vm1, %v541_v32  ;;  %v1329_v4 = vld [vmem:[%s2706_s0 + $0x60] sm:$0xff]  ;;  %v1330_v5 = vld [vmem:[%s2706_s0 + $0x68] sm:$0xff]  ;;  %v1331_v6 = vld [vmem:[%s2706_s0 + $0x70] sm:$0xff] }
  0x4d   : > { %1340 = vperm.xlu0 %2457, %v1318_v58   ;;  %1350 = vperm.xlu1 %2458, %v1320_v59   ;;  %v1332_v7 = vld [vmem:[%s2706_s0 + $0x78] sm:$0xff]  ;;  %vm2890_vm4 = vmpackc.low %vm1011_vm3, %vm1011_vm3 }
  0x4e   : > { %v2883_v8 = vstv %s573_s21 }
  0x4f   : > { %2173 = vmatmul.mubr.msk.f32.gmra.mrb[4].mxu1 %vm574_vm1, %v2790_v33  ;;  %2141 = vmatmul.mubr.msk.f32.gmra.mrb[4].mxu0 %vm574_vm1, %v542_v34 }
  0x50   : > { %2175 = vmatprep.mubr.msk.f32.mxu1 %vm574_vm1, %v2795_v35  ;;  %2143 = vmatprep.mubr.msk.f32.mxu0 %vm574_vm1, %v543_v36 }
  0x51   : > { %1355 = vperm.xlu0 %2457, %v1321_v60   ;;  %1360 = vperm.xlu1 %2458, %v1322_v61  }
  0x53   : > { %2176 = vmatmul.mubr.msk.f32.gmra.mrb[6].mxu1 %vm574_vm1, %v2804_v37  ;;  %2144 = vmatmul.mubr.msk.f32.gmra.mrb[6].mxu0 %vm574_vm1, %v544_v38 }
  0x54   : > { %2178 = vmatprep.mubr.msk.f32.mxu1 %vm574_vm1, %v2809_v39  ;;  %2146 = vmatprep.mubr.msk.f32.mxu0 %vm574_vm1, %v545_v40 }
  0x55   : > { %1365 = vperm.xlu0 %2457, %v1323_v62   ;;  %1370 = vperm.xlu1 %2458, %v1324_v63  }
  0x57   : > { %2179 = vmatmul.mubr.msk.f32.gmra.mrb[8].mxu1 %vm574_vm1, %v2818_v41  ;;  %2147 = vmatmul.mubr.msk.f32.gmra.mrb[8].mxu0 %vm574_vm1, %v546_v42 }
  0x58   : > { %2181 = vmatprep.mubr.msk.f32.mxu1 %vm574_vm1, %v2823_v43  ;;  %2149 = vmatprep.mubr.msk.f32.mxu0 %vm574_vm1, %v547_v44 }
  0x59   : > { %1375 = vperm.xlu0 %2457, %v1325_v0   ;;  %1380 = vperm.xlu1 %2458, %v1326_v1  }
  0x5b   : > { %2182 = vmatmul.mubr.msk.f32.gmra.mrb[10].mxu1 %vm574_vm1, %v2832_v45  ;;  %2150 = vmatmul.mubr.msk.f32.gmra.mrb[10].mxu0 %vm574_vm1, %v548_v46 }
  0x5c   : > { %2184 = vmatprep.mubr.msk.f32.mxu1 %vm574_vm1, %v2837_v47  ;;  %2152 = vmatprep.mubr.msk.f32.mxu0 %vm574_vm1, %v549_v48 }
  0x5d   : > { %1385 = vperm.xlu0 %2457, %v1327_v2   ;;  %1390 = vperm.xlu1 %2458, %v1328_v3  }
  0x5f   : > { %2185 = vmatmul.mubr.msk.f32.gmra.mrb[12].mxu1 %vm574_vm1, %v2846_v49  ;;  %2153 = vmatmul.mubr.msk.f32.gmra.mrb[12].mxu0 %vm574_vm1, %v550_v50 }
  0x60   : > { %2187 = vmatprep.mubr.msk.f32.mxu1 %vm574_vm1, %v2851_v51  ;;  %2155 = vmatprep.mubr.msk.f32.mxu0 %vm574_vm1, %v551_v52 }
  0x61   : > { %1395 = vperm.xlu0 %2457, %v1329_v4   ;;  %1400 = vperm.xlu1 %2458, %v1330_v5  }
  0x63   : > { %2188 = vmatmul.mubr.msk.f32.gmra.mrb[14].mxu1 %vm574_vm1, %v2860_v53  ;;  %2156 = vmatmul.mubr.msk.f32.gmra.mrb[14].mxu0 %vm574_vm1, %v552_v54 }
  0x65   : > { %1405 = vperm.xlu0 %2457, %v1331_v6   ;;  %1410 = vperm.xlu1 %2458, %v1332_v7  }
 0x11a   : > { %v2168_v9 = vpop.f32.mrb[0].mxu1  ;;  %v2136_v10 = vpop.f32.mrb[0].mxu0 }
 0x11b   : > { %v996_v11 = vsel %vm978_vm2, 1.0, %v2168_v9  ;;  %v882_v12 = vpop.f32.mrb[1].mxu1  ;;  %v963_v13 = vadd.f32 %v2136_v10, %v2883_v8  ;;  %v689_v14 = vpop.f32.mrb[1].mxu0 }
 0x11c   : > { %v995_v15 = vsel %vm978_vm2, 1.0, %v882_v12  ;;  %v962_v17 = vadd.f32 %v2883_v8, %v689_v14 }
 0x11d   : > { %v2318_v18 = vpack.c.bf16 %v996_v11, %v995_v15  ;;  %v2896_v19 = vsel %vm978_vm2, %v963_v13, 1.0 }
 0x11e   : > { %v2171_v20 = vpop.f32.mrb[2].mxu1  ;;  %v979_v21 = vsel %vm978_vm2, %v962_v17, 1.0  ;;  %v2139_v23 = vpop.f32.mrb[2].mxu0 }
 0x11f   : > { %2320 = vmatprep.subr.msk.bf16.mxu0 %vm2890_vm4, %v2318_v18  ;;  %v998_v24 = vsel %vm978_vm2, 1.0, %v2171_v20  ;;  %v892_v26 = vpop.f32.mrb[3].mxu1  ;;  %v965_v28 = vadd.f32 %v2139_v23, %v2883_v8  ;;  %v699_v30 = vpop.f32.mrb[3].mxu0  ;;  %2222 = vmatprep.mubr.msk.f32.mxu0 %vm1011_vm3, %v979_v21 }
 0x120   : > { %2323 = vmatpush3.bf16.xpose.msk.msra.mxu0 %vm2890_vm4, %v2318_v18  ;;  %v997_v32 = vsel %vm978_vm2, 1.0, %v892_v26  ;;  %v964_v34 = vadd.f32 %v2883_v8, %v699_v30 }
 0x121   : > { %v2324_v36 = vpack.c.bf16 %v998_v24, %v997_v32  ;;  %v2909_v38 = vsel %vm978_vm2, %v965_v28, 1.0 }
 0x122   : > { %v2174_v40 = vpop.f32.mrb[4].mxu1  ;;  %v2912_v42 = vsel %vm978_vm2, %v964_v34, 1.0  ;;  %v2142_v44 = vpop.f32.mrb[4].mxu0 }
 0x123   : > { %2326 = vmatprep.subr.msk.bf16.mxu0 %vm2890_vm4, %v2324_v36  ;;  %v1000_v46 = vsel %vm978_vm2, 1.0, %v2174_v40  ;;  %v902_v48 = vpop.f32.mrb[5].mxu1  ;;  %v967_v50 = vadd.f32 %v2142_v44, %v2883_v8  ;;  %v709_v52 = vpop.f32.mrb[5].mxu0 }
 0x124   : > { %v999_v54 = vsel %vm978_vm2, 1.0, %v902_v48  ;;  %v966_v55 = vadd.f32 %v2883_v8, %v709_v52 }
 0x125   : > { %v2330_v56 = vpack.c.bf16 %v1000_v46, %v999_v54  ;;  %v2921_v57 = vsel %vm978_vm2, %v967_v50, 1.0 }
 0x126   : > { %v2177_v58 = vpop.f32.mrb[6].mxu1  ;;  %v2924_v59 = vsel %vm978_vm2, %v966_v55, 1.0  ;;  %v2145_v60 = vpop.f32.mrb[6].mxu0 }
 0x127   : > { %v1002_v61 = vsel %vm978_vm2, 1.0, %v2177_v58  ;;  %v912_v62 = vpop.f32.mrb[7].mxu1  ;;  %v969_v63 = vadd.f32 %v2145_v60, %v2883_v8  ;;  %v719_v0 = vpop.f32.mrb[7].mxu0 }
 0x128   : > { %2329 = vmatpush3.bf16.xpose.msk.msra.mxu0 %vm2890_vm4, %v2324_v36  ;;  %v1001_v1 = vsel %vm978_vm2, 1.0, %v912_v62  ;;  %v968_v2 = vadd.f32 %v2883_v8, %v719_v0 }
 0x129   : > { %2332 = vmatprep.subr.msk.bf16.mxu0 %vm2890_vm4, %v2330_v56  ;;  %v2336_v3 = vpack.c.bf16 %v1002_v61, %v1001_v1  ;;  %v2935_v4 = vsel %vm978_vm2, %v969_v63, 1.0 }
 0x12a   : > { %v2180_v5 = vpop.f32.mrb[8].mxu1  ;;  %v985_v6 = vsel %vm978_vm2, %v968_v2, 1.0  ;;  %v2148_v7 = vpop.f32.mrb[8].mxu0 }
 0x12b   : > { %v1004_v9 = vsel %vm978_vm2, 1.0, %v2180_v5  ;;  %v922_v10 = vpop.f32.mrb[9].mxu1  ;;  %v971_v11 = vadd.f32 %v2148_v7, %v2883_v8  ;;  %v729_v12 = vpop.f32.mrb[9].mxu0 }
 0x12c   : > { %v1003_v13 = vsel %vm978_vm2, 1.0, %v922_v10  ;;  %v970_v14 = vadd.f32 %v2883_v8, %v729_v12 }
 0x12d   : > { %v2342_v15 = vpack.c.bf16 %v1004_v9, %v1003_v13  ;;  %v988_v17 = vsel %vm978_vm2, %v971_v11, 1.0 }
 0x12e   : > { %v2183_v18 = vpop.f32.mrb[10].mxu1  ;;  %v987_v20 = vsel %vm978_vm2, %v970_v14, 1.0  ;;  %v2151_v21 = vpop.f32.mrb[10].mxu0 }
 0x12f   : > { %v1006_v23 = vsel %vm978_vm2, 1.0, %v2183_v18  ;;  %v932_v24 = vpop.f32.mrb[11].mxu1  ;;  %v973_v26 = vadd.f32 %v2151_v21, %v2883_v8  ;;  %v739_v28 = vpop.f32.mrb[11].mxu0 }
 0x130   : > { %2335 = vmatpush3.bf16.xpose.msk.msra.mxu0 %vm2890_vm4, %v2330_v56  ;;  %v1005_v30 = vsel %vm978_vm2, 1.0, %v932_v24  ;;  %v972_v32 = vadd.f32 %v2883_v8, %v739_v28 }
 0x131   : > { %2338 = vmatprep.subr.msk.bf16.mxu0 %vm2890_vm4, %v2336_v3  ;;  %v2348_v34 = vpack.c.bf16 %v1006_v23, %v1005_v30  ;;  %v990_v36 = vsel %vm978_vm2, %v973_v26, 1.0 }
 0x132   : > { %v2186_v40 = vpop.f32.mrb[12].mxu1  ;;  %v989_v44 = vsel %vm978_vm2, %v972_v32, 1.0  ;;  %v2154_v46 = vpop.f32.mrb[12].mxu0 }
 0x133   : > { %v1008_v48 = vsel %vm978_vm2, 1.0, %v2186_v40  ;;  %v942_v50 = vpop.f32.mrb[13].mxu1  ;;  %v975_v52 = vadd.f32 %v2154_v46, %v2883_v8  ;;  %v749_v54 = vpop.f32.mrb[13].mxu0 }
 0x134   : > { %v1007_v55 = vsel %vm978_vm2, 1.0, %v942_v50  ;;  %v974_v56 = vadd.f32 %v2883_v8, %v749_v54 }
 0x135   : > { %v2354_v58 = vpack.c.bf16 %v1008_v48, %v1007_v55  ;;  %v992_v60 = vsel %vm978_vm2, %v975_v52, 1.0  ;;  %v1984_v52 = vld [vmem:[%s2708_s22] sm:$0xff]  }
 0x136   : > { %v2189_v61 = vpop.f32.mrb[14].mxu1  ;;  %v991_v62 = vsel %vm978_vm2, %v974_v56, 1.0  ;;  %v2157_v63 = vpop.f32.mrb[14].mxu0  ;;  %v1986_v55 = vunpack.c.h.bf16 %v1984_v52  ;;  %v2015_v56 = vld [vmem:[%s2708_s22 + $0x8] sm:$0xff]  }
 0x137   : > { %v1010_v0 = vsel %vm978_vm2, 1.0, %v2189_v61  ;;  %v952_v1 = vpop.f32.mrb[15].mxu1  ;;  %v977_v2 = vadd.f32 %v2157_v63, %v2883_v8  ;;  %v759_v5 = vpop.f32.mrb[15].mxu0 }
 0x138   : > { %2341 = vmatpush3.bf16.xpose.msk.msra.mxu0 %vm2890_vm4, %v2336_v3  ;;  %v1009_v7 = vsel %vm978_vm2, 1.0, %v952_v1  ;;  %v976_v9 = vadd.f32 %v2883_v8, %v759_v5  ;;  %v1336_v8 = vpop.permute.xlu0 %1335  ;;  %v2016_v5 = vld [vmem:[%s2708_s22 + $0x10] sm:$0xff]  }
 0x139   : > { %2344 = vmatprep.subr.msk.bf16.mxu0 %vm2890_vm4, %v2342_v15  ;;  %v2360_v10 = vpack.c.bf16 %v1010_v0, %v1009_v7  ;;  %v994_v11 = vsel %vm978_vm2, %v977_v2, 1.0  ;;  %v1413_v16 = vmul.f32 %v1336_v8, %v2756_v22  ;;  %v1989_v0 = vunpack.c.l.bf16 %v2015_v56 }
 0x13a   : > { %v993_v12 = vsel %vm978_vm2, %v976_v9, 1.0  ;;  %v1990_v2 = vunpack.c.h.bf16 %v2015_v56  ;;  %v1993_v8 = vunpack.c.l.bf16 %v2016_v5  ;;  %v1429_v56 = vld [vmem:[%s2696_s10] sm:$0xff] }
 0x140   : > { %2347 = vmatpush3.bf16.xpose.msk.msra.mxu0 %vm2890_vm4, %v2342_v15 }
 0x141   : > { %2350 = vmatprep.subr.msk.bf16.mxu0 %vm2890_vm4, %v2348_v34 }
 0x148   : > { %2353 = vmatpush3.bf16.xpose.msk.msra.mxu0 %vm2890_vm4, %v2348_v34 }
 0x149   : > { %2356 = vmatprep.subr.msk.bf16.mxu0 %vm2890_vm4, %v2354_v58 }
 0x150   : > { %2359 = vmatpush3.bf16.xpose.msk.msra.mxu0 %vm2890_vm4, %v2354_v58 }
 0x151   : > { %2362 = vmatprep.subr.msk.bf16.mxu0 %vm2890_vm4, %v2360_v10 }
 0x158   : > { %2365 = vmatpush3.bf16.xpose.msk.msra.mxu0 %vm2890_vm4, %v2360_v10 }
 0x15f   : > { %2223 = vmatmul.mubr.msk.f32.vlgmr.msra.gmra.mrb[16].mxu0 %vm1011_vm3, %v2896_v19  ;;  %v1346_v19 = vpop.permute.xlu1 %1345 }
 0x160   : > { %2225 = vmatprep.mubr.msk.f32.mxu0 %vm1011_vm3, %v2912_v42 }
 0x163   : > { %2226 = vmatmul.mubr.msk.f32.gmra.mrb[18].mxu0 %vm1011_vm3, %v2909_v38  ;;  %v1341_v38 = vpop.permute.xlu0 %1340  ;;  %v1351_v3 = vpop.permute.xlu1 %1350 }
 0x164   : > { %2228 = vmatprep.mubr.msk.f32.mxu0 %vm1011_vm3, %v2924_v59  ;;  %v1414_v42 = vmul.f32 %v1341_v38, %v2763_v25  ;;  %v2017_v38 = vld [vmem:[%s2708_s22 + $0x18] sm:$0xff]  }
 0x166   : > { %v2366_v59 = vpack.c.bf16 %v1414_v42, %v1413_v16 }
 0x167   : > { %2229 = vmatmul.mubr.msk.f32.gmra.mrb[20].mxu0 %vm1011_vm3, %v2921_v57  ;;  %v1415_v57 = vmul.f32 %v1346_v19, %v2767_v27  ;;  %v1361_v15 = vpop.permute.xlu1 %1360  ;;  %v1994_v19 = vunpack.c.h.bf16 %v2016_v5 }
 0x168   : > { %2231 = vmatprep.mubr.msk.f32.mxu0 %vm1011_vm3, %v985_v6  ;;  %v1416_v6 = vmul.f32 %v1351_v3, %v2776_v29  ;;  %2367 = vmatprep.subr.bf16.mxu1 %v2366_v59 }
 0x169   : > { %2369 = vmatpush3.bf16.msra.mxu1 %v2366_v59 }
 0x16a   : > { %v2370_v13 = vpack.c.bf16 %v1416_v6, %v1415_v57  ;;  %v1997_v6 = vunpack.c.l.bf16 %v2017_v38 }
 0x16b   : > { %2232 = vmatmul.mubr.msk.f32.gmra.mrb[22].mxu0 %vm1011_vm3, %v2935_v4  ;;  %v1356_v4 = vpop.permute.xlu0 %1355  ;;  %v1371_v27 = vpop.permute.xlu1 %1370 }
 0x16c   : > { %2234 = vmatprep.mubr.msk.f32.mxu0 %vm1011_vm3, %v987_v20  ;;  %v1417_v14 = vmul.f32 %v1356_v4, %v2781_v31  ;;  %2371 = vmatprep.subr.bf16.mxu1 %v2370_v13  ;;  %v1420_v21 = vmul.f32 %v1371_v27, %v2804_v37 }
 0x16d   : > { %2373 = vmatpush3.bf16.msra.mxu1 %v2370_v13 }
 0x16f   : > { %2235 = vmatmul.mubr.msk.f32.gmra.mrb[24].mxu0 %vm1011_vm3, %v988_v17  ;;  %v1366_v22 = vpop.permute.xlu0 %1365  ;;  %v1418_v17 = vmul.f32 %v1361_v15, %v2790_v33  ;;  %v1381_v24 = vpop.permute.xlu1 %1380  ;;  %v2018_v15 = vld [vmem:[%s2708_s22 + $0x20] sm:$0xff]  }
 0x170   : > { %2237 = vmatprep.mubr.msk.f32.mxu0 %vm1011_vm3, %v989_v44  ;;  %v1419_v25 = vmul.f32 %v1366_v22, %v2795_v35  ;;  %v1422_v26 = vmul.f32 %v1381_v24, %v2818_v41 }
 0x171   : > { %v2374_v18 = vpack.c.bf16 %v1418_v17, %v1417_v14  ;;  %v1998_v14 = vunpack.c.h.bf16 %v2017_v38  ;;  %v1435_v38 = vld [vmem:[%s2696_s10 + $0x30] sm:$0xff] }
 0x172   : > { %v2378_v29 = vpack.c.bf16 %v1420_v21, %v1419_v25 }
 0x173   : > { %2238 = vmatmul.mubr.msk.f32.gmra.mrb[26].mxu0 %vm1011_vm3, %v990_v36  ;;  %v1376_v20 = vpop.permute.xlu0 %1375  ;;  %2375 = vmatprep.subr.bf16.mxu1 %v2374_v18  ;;  %v1391_v30 = vpop.permute.xlu1 %1390 }
 0x174   : > { %2240 = vmatprep.mubr.msk.f32.mxu0 %vm1011_vm3, %v991_v62  ;;  %2377 = vmatpush3.bf16.msra.mxu1 %v2374_v18  ;;  %v1421_v23 = vmul.f32 %v1376_v20, %v2809_v39  ;;  %v1424_v32 = vmul.f32 %v1391_v30, %v2832_v45  ;;  %v2001_v20 = vunpack.c.l.bf16 %v2018_v15 }
 0x175   : > { %2379 = vmatprep.subr.bf16.mxu1 %v2378_v29 }
 0x176   : > { %v2382_v33 = vpack.c.bf16 %v1422_v26, %v1421_v23  ;;  %v2019_v23 = vld [vmem:[%s2708_s22 + $0x28] sm:$0xff]  }
 0x177   : > { %2241 = vmatmul.mubr.msk.f32.gmra.mrb[28].mxu0 %vm1011_vm3, %v992_v60  ;;  %v1386_v31 = vpop.permute.xlu0 %1385  ;;  %v1401_v36 = vpop.permute.xlu1 %1400  ;;  %v2005_v30 = vunpack.c.l.bf16 %v2019_v23 }
 0x178   : > { %2243 = vmatprep.mubr.msk.f32.mxu0 %vm1011_vm3, %v993_v12  ;;  %2381 = vmatpush3.bf16.msra.mxu1 %v2378_v29  ;;  %v1423_v28 = vmul.f32 %v1386_v31, %v2823_v43  ;;  %v1426_v40 = vmul.f32 %v1401_v36, %v2846_v49  ;;  %v2002_v29 = vunpack.c.h.bf16 %v2018_v15 }
 0x179   : > { %2383 = vmatprep.subr.bf16.mxu1 %v2382_v33 }
 0x17a   : > { %v2386_v37 = vpack.c.bf16 %v1424_v32, %v1423_v28  ;;  %v2006_v32 = vunpack.c.h.bf16 %v2019_v23  ;;  %v1441_v23 = vld [vmem:[%s2696_s10 + $0x60] sm:$0xff] }
 0x17b   : > { %2244 = vmatmul.mubr.msk.f32.gmra.mrb[30].mxu0 %vm1011_vm3, %v994_v11  ;;  %v1396_v35 = vpop.permute.xlu0 %1395  ;;  %v1411_v43 = vpop.permute.xlu1 %1410 }
 0x17c   : > { %2385 = vmatpush3.bf16.msra.mxu1 %v2382_v33  ;;  %v1425_v34 = vmul.f32 %v1396_v35, %v2837_v47  ;;  %v1428_v46 = vmul.f32 %v1411_v43, %v2860_v53  ;;  %v1985_v53 = vunpack.c.l.bf16 %v1984_v52  ;;  %v2021_v43 = vld [vmem:[%s2708_s22 + $0x38] sm:$0xff]  }
 0x17d   : > { %2387 = vmatprep.subr.bf16.mxu1 %v2386_v37 }
 0x17e   : > { %v2390_v41 = vpack.c.bf16 %v1426_v40, %v1425_v34 }
 0x17f   : > { %v1406_v39 = vpop.permute.xlu0 %1405 }
 0x180   : > { %2389 = vmatpush3.bf16.msra.mxu1 %v2386_v37  ;;  %v1427_v44 = vmul.f32 %v1406_v39, %v2851_v51  ;;  %v2020_v37 = vld [vmem:[%s2708_s22 + $0x30] sm:$0xff]  }
 0x181   : > { %2391 = vmatprep.subr.bf16.mxu1 %v2390_v41  ;;  %v2009_v40 = vunpack.c.l.bf16 %v2020_v37 }
 0x182   : > { %v2394_v45 = vpack.c.bf16 %v1428_v46, %v1427_v44  ;;  %v2010_v44 = vunpack.c.h.bf16 %v2020_v37 }
 0x184   : > { %2393 = vmatpush3.bf16.msra.mxu1 %v2390_v41 }
 0x185   : > { %2395 = vmatprep.subr.bf16.mxu1 %v2394_v45 }
 0x188   : > { %2397 = vmatpush3.bf16.msra.mxu1 %v2394_v45 }
 0x232   : > { %v2224_v47 = vpop.f32.mrb[16].mxu0 }
 0x233   : > { %2459 = vtanh.f32 %v2224_v47  ;;  %v1174_v48 = vpop.f32.mrb[17].mxu0 }
 0x234   : > { %2461 = vtanh.f32 %v1174_v48  ;;  %v2013_v48 = vunpack.c.l.bf16 %v2021_v43 }
 0x236   : > { %v2227_v49 = vpop.f32.mrb[18].mxu0 }
 0x237   : > { %2463 = vtanh.f32 %v2227_v49  ;;  %v1184_v50 = vpop.f32.mrb[19].mxu0 }
 0x238   : > { %2465 = vtanh.f32 %v1184_v50  ;;  %v2014_v50 = vunpack.c.h.bf16 %v2021_v43  ;;  %v1647_v43 = vld [vmem:[%s2691_s24 + $0x28] sm:$0xff] (!%p1979_p13) }
 0x23a   : > { %v2230_v51 = vpop.f32.mrb[20].mxu0 }
 0x23b   : > { %2467 = vtanh.f32 %v2230_v51  ;;  %v1194_v54 = vpop.f32.mrb[21].mxu0 }
 0x23c   : > { %2469 = vtanh.f32 %v1194_v54 }
 0x23d   : > { %v2460_v58 = vpop.eup %2459 }
 0x23e   : > { %v2462_v60 = vpop.eup %2461  ;;  %v2233_v61 = vpop.f32.mrb[22].mxu0  ;;  %v1302_v1 = vmul.f32 %v2460_v58, %v1986_v55  ;;  %v1430_v55 = vld [vmem:[%s2696_s10 + $0x8] sm:$0xff] }
 0x23f   : > { %2471 = vtanh.f32 %v2233_v61  ;;  %v1204_v62 = vpop.f32.mrb[23].mxu0  ;;  %v1301_v63 = vmul.f32 %v2462_v60, %v1985_v53 }
 0x240   : > { %2473 = vtanh.f32 %v1204_v62 }
 0x241   : > { %v2464_v7 = vpop.eup %2463  ;;  %2278 = vmatprep.mubr.f32.mxu1 %v1301_v63  ;;  %v1432_v63 = vld [vmem:[%s2696_s10 + $0x18] sm:$0xff] }
 0x242   : > { %v2466_v9 = vpop.eup %2465  ;;  %v2236_v10 = vpop.f32.mrb[24].mxu0  ;;  %2279 = vmatmul.mubr.f32.vlgmr.msra.gmra.mrb[16].mxu1 %v1302_v1  ;;  %v1304_v16 = vmul.f32 %v2464_v7, %v1990_v2 }
 0x243   : > { %2475 = vtanh.f32 %v2236_v10  ;;  %v1214_v11 = vpop.f32.mrb[25].mxu0  ;;  %v1303_v12 = vmul.f32 %v2466_v9, %v1989_v0  ;;  %v1431_v0 = vld [vmem:[%s2696_s10 + $0x10] sm:$0xff]  ;;  %v1434_v9 = vld [vmem:[%s2696_s10 + $0x28] sm:$0xff]  ;;  %v1433_v10 = vld [vmem:[%s2696_s10 + $0x20] sm:$0xff] }
 0x244   : > { %2477 = vtanh.f32 %v1214_v11 }
 0x245   : > { %v2468_v42 = vpop.eup %2467  ;;  %2281 = vmatprep.mubr.f32.mxu1 %v1303_v12 }
 0x246   : > { %v2470_v57 = vpop.eup %2469  ;;  %v2239_v59 = vpop.f32.mrb[26].mxu0  ;;  %2282 = vmatmul.mubr.f32.gmra.mrb[18].mxu1 %v1304_v16  ;;  %v1306_v13 = vmul.f32 %v2468_v42, %v1994_v19  ;;  %v1436_v19 = vld [vmem:[%s2696_s10 + $0x38] sm:$0xff] }
 0x247   : > { %2479 = vtanh.f32 %v2239_v59  ;;  %v1224_v3 = vpop.f32.mrb[27].mxu0  ;;  %v1305_v4 = vmul.f32 %v2470_v57, %v1993_v8 }
 0x248   : > { %2481 = vtanh.f32 %v1224_v3 }
 0x249   : > { %v2472_v22 = vpop.eup %2471  ;;  %2284 = vmatprep.mubr.f32.mxu1 %v1305_v4  ;;  %v1438_v4 = vld [vmem:[%s2696_s10 + $0x48] sm:$0xff] }
 0x24a   : > { %v2474_v17 = vpop.eup %2473  ;;  %v2242_v18 = vpop.f32.mrb[28].mxu0  ;;  %2285 = vmatmul.mubr.f32.gmra.mrb[20].mxu1 %v1306_v13  ;;  %v1308_v21 = vmul.f32 %v2472_v22, %v1998_v14 }
 0x24b   : > { %2483 = vtanh.f32 %v2242_v18  ;;  %v1234_v25 = vpop.f32.mrb[29].mxu0  ;;  %v1307_v27 = vmul.f32 %v2474_v17, %v1997_v6  ;;  %v1437_v6 = vld [vmem:[%s2696_s10 + $0x40] sm:$0xff]  ;;  %v1440_v17 = vld [vmem:[%s2696_s10 + $0x58] sm:$0xff]  ;;  %v1439_v18 = vld [vmem:[%s2696_s10 + $0x50] sm:$0xff] }
 0x24c   : > { %2485 = vtanh.f32 %v1234_v25 }
 0x24d   : > { %v2476_v24 = vpop.eup %2475  ;;  %2287 = vmatprep.mubr.f32.mxu1 %v1307_v27 }
 0x24e   : > { %v2478_v31 = vpop.eup %2477  ;;  %v2245_v26 = vpop.f32.mrb[30].mxu0  ;;  %2288 = vmatmul.mubr.f32.gmra.mrb[22].mxu1 %v1308_v21  ;;  %v1310_v35 = vmul.f32 %v2476_v24, %v2002_v29  ;;  %v1442_v29 = vld [vmem:[%s2696_s10 + $0x68] sm:$0xff] }
 0x24f   : > { %2487 = vtanh.f32 %v2245_v26  ;;  %v1244_v33 = vpop.f32.mrb[31].mxu0  ;;  %v1309_v28 = vmul.f32 %v2478_v31, %v2001_v20 }
 0x250   : > { %2489 = vtanh.f32 %v1244_v33 }
 0x251   : > { %v2480_v34 = vpop.eup %2479  ;;  %2290 = vmatprep.mubr.f32.mxu1 %v1309_v28  ;;  %v1444_v28 = vld [vmem:[%s2696_s10 + $0x78] sm:$0xff] }
 0x252   : > { %v2482_v36 = vpop.eup %2481  ;;  %2291 = vmatmul.mubr.f32.gmra.mrb[24].mxu1 %v1310_v35  ;;  %v1312_v41 = vmul.f32 %v2480_v34, %v2006_v32 }
 0x253   : > { %v1311_v39 = vmul.f32 %v2482_v36, %v2005_v30  ;;  %v1443_v30 = vld [vmem:[%s2696_s10 + $0x70] sm:$0xff] }
 0x254   : > { %v1644_v36 = vld [vmem:[%s2691_s24 + $0x10] sm:$0xff] (!%p1979_p13) }
 0x255   : > { %v2484_v46 = vpop.eup %2483  ;;  %2293 = vmatprep.mubr.f32.mxu1 %v1311_v39  ;;  %v1642_v39 = vld [vmem:[%s2691_s24] sm:$0xff] (!%p1979_p13) }
 0x256   : > { %v2486_v45 = vpop.eup %2485  ;;  %2294 = vmatmul.mubr.f32.gmra.mrb[26].mxu1 %v1312_v41  ;;  %v1314_v49 = vmul.f32 %v2484_v46, %v2010_v44  ;;  %v1645_v41 = vld [vmem:[%s2691_s24 + $0x18] sm:$0xff] (!%p1979_p13)  ;;  %v1643_v44 = vld [vmem:[%s2691_s24 + $0x8] sm:$0xff] (!%p1979_p13)  ;;  %v1646_v46 = vld [vmem:[%s2691_s24 + $0x20] sm:$0xff] (!%p1979_p13) }
 0x257   : > { %v1313_v47 = vmul.f32 %v2486_v45, %v2009_v40  ;;  %v2551_v40 = vmov (!%p1979_p13), 0   ;;  %v1649_v45 = vld [vmem:[%s2691_s24 + $0x38] sm:$0xff] (!%p1979_p13) }
 0x258   : > { %2492 = vset.pattern.permute.xlu1 (!%p1979_p13), %v2551_v40  ;;  %2491 = vset.pattern.permute.xlu0 (!%p1979_p13), %v2551_v40 }
 0x259   : > { %v2488_v52 = vpop.eup %2487  ;;  %2296 = vmatprep.mubr.f32.mxu1 %v1313_v47  ;;  %1670 = vperm.xlu1 (!%p1979_p13), %2492, %v1644_v36   ;;  %v1648_v47 = vld [vmem:[%s2691_s24 + $0x30] sm:$0xff] (!%p1979_p13) }
 0x25a   : > { %v2490_v51 = vpop.eup %2489  ;;  %2297 = vmatmul.mubr.f32.gmra.mrb[28].mxu1 %v1314_v49  ;;  %v1316_v53 = vmul.f32 %v2488_v52, %v2014_v50  ;;  %1660 = vperm.xlu0 (!%p1979_p13), %2491, %v1642_v39   ;;  %v1650_v49 = vld [vmem:[%s2691_s24 + $0x40] sm:$0xff] (!%p1979_p13)  ;;  %v1653_v50 = vld [vmem:[%s2691_s24 + $0x58] sm:$0xff] (!%p1979_p13)  ;;  %v1652_v52 = vld [vmem:[%s2691_s24 + $0x50] sm:$0xff] (!%p1979_p13) }
 0x25b   : > { %v1315_v54 = vmul.f32 %v2490_v51, %v2013_v48  ;;  %v1651_v48 = vld [vmem:[%s2691_s24 + $0x48] sm:$0xff] (!%p1979_p13) }
 0x25c   : > { %v1655_v51 = vld [vmem:[%s2691_s24 + $0x68] sm:$0xff] (!%p1979_p13) }
 0x25d   : > { %2299 = vmatprep.mubr.f32.mxu1 %v1315_v54  ;;  %1675 = vperm.xlu1 (!%p1979_p13), %2492, %v1645_v41   ;;  %v1654_v54 = vld [vmem:[%s2691_s24 + $0x60] sm:$0xff] (!%p1979_p13) }
 0x25e   : > { %2300 = vmatmul.mubr.f32.gmra.mrb[30].mxu1 %v1316_v53  ;;  %1665 = vperm.xlu0 (!%p1979_p13), %2491, %v1643_v44   ;;  %v1657_v53 = vld [vmem:[%s2691_s24 + $0x78] sm:$0xff] (!%p1979_p13) }
 0x261   : > { %1685 = vperm.xlu1 (!%p1979_p13), %2492, %v1647_v43  }
 0x262   : > { %1680 = vperm.xlu0 (!%p1979_p13), %2491, %v1646_v46  }
 0x265   : > { %1695 = vperm.xlu1 (!%p1979_p13), %2492, %v1649_v45  }
 0x266   : > { %1690 = vperm.xlu0 (!%p1979_p13), %2491, %v1648_v47  }
 0x269   : > { %1705 = vperm.xlu1 (!%p1979_p13), %2492, %v1651_v48  }
 0x26a   : > { %1700 = vperm.xlu0 (!%p1979_p13), %2491, %v1650_v49  }
 0x26d   : > { %1715 = vperm.xlu1 (!%p1979_p13), %2492, %v1653_v50  }
 0x26e   : > { %1710 = vperm.xlu0 (!%p1979_p13), %2491, %v1652_v52  }
 0x271   : > { %1725 = vperm.xlu1 (!%p1979_p13), %2492, %v1655_v51  }
 0x272   : > { %1720 = vperm.xlu0 (!%p1979_p13), %2491, %v1654_v54  }
 0x275   : > { %1735 = vperm.xlu1 (!%p1979_p13), %2492, %v1657_v53  }
 0x315   : > { %v2280_v58 = vpop.f32.mrb[16].mxu1 }
 0x316   : > { %v1591_v60 = vadd.f32 %v2280_v58, %v1430_v55  ;;  %v1511_v61 = vpop.f32.mrb[17].mxu1  ;;  %v1656_v55 = vld [vmem:[%s2691_s24 + $0x70] sm:$0xff] (!%p1979_p13) }
 0x317   : > { %v1590_v62 = vadd.f32 %v1511_v61, %v1429_v56  ;;  %1730 = vperm.xlu0 (!%p1979_p13), %2491, %v1656_v55   ;;  %v1661_v61 = vpop.permute.xlu0 (!%p1979_p13), %1660 }
 0x318   : > { %1607 = vst.msk [vmem:[%s2696_s10 + $0x8] sm:$0xff] %vm574_vm1, %v1591_v60  ;;  %v1671_v60 = vpop.permute.xlu1 (!%p1979_p13), %1670 }
 0x319   : > { %1606 = vst.msk [vmem:[%s2696_s10] sm:$0xff] %vm574_vm1, %v1590_v62  ;;  %v2283_v1 = vpop.f32.mrb[18].mxu1 }
 0x31a   : > { %v1593_v2 = vadd.f32 %v2283_v1, %v1432_v63  ;;  %v1521_v5 = vpop.f32.mrb[19].mxu1 }
 0x31b   : > { %v1592_v7 = vadd.f32 %v1521_v5, %v1431_v0  ;;  %v1666_v5 = vpop.permute.xlu0 (!%p1979_p13), %1665 }
 0x31c   : > { %1609 = vst.msk [vmem:[%s2696_s10 + $0x18] sm:$0xff] %vm574_vm1, %v1593_v2  ;;  %v1676_v2 = vpop.permute.xlu1 (!%p1979_p13), %1675 }
 0x31d   : > { %1608 = vst.msk [vmem:[%s2696_s10 + $0x10] sm:$0xff] %vm574_vm1, %v1592_v7  ;;  %v2286_v11 = vpop.f32.mrb[20].mxu1 }
 0x31e   : > { %v1595_v12 = vadd.f32 %v2286_v11, %v1434_v9  ;;  %v1531_v8 = vpop.f32.mrb[21].mxu1 }
 0x31f   : > { %v1594_v16 = vadd.f32 %v1531_v8, %v1433_v10  ;;  %v1627_v1 = vld [vmem:[%s2696_s10 + $0x8] sm:$0xff] (!%p1979_p13)  ;;  %v1681_v8 = vpop.permute.xlu0 (!%p1979_p13), %1680 }
 0x320   : > { %1611 = vst.msk [vmem:[%s2696_s10 + $0x28] sm:$0xff] %vm574_vm1, %v1595_v12  ;;  %v1626_v58 = vld [vmem:[%s2696_s10] sm:$0xff] (!%p1979_p13)  ;;  %v1739_v9 = vmul.f32 (!%p1979_p13), %v1666_v5, %v1627_v1  ;;  %v1686_v12 = vpop.permute.xlu1 (!%p1979_p13), %1685 }
 0x321   : > { %1610 = vst.msk [vmem:[%s2696_s10 + $0x20] sm:$0xff] %vm574_vm1, %v1594_v16  ;;  %v2289_v42 = vpop.f32.mrb[22].mxu1  ;;  %v1738_v63 = vmul.f32 (!%p1979_p13), %v1661_v61, %v1626_v58 }
 0x322   : > { %v1597_v57 = vadd.f32 %v2289_v42, %v1436_v19  ;;  %v1541_v59 = vpop.f32.mrb[23].mxu1  ;;  %1755 = vst.msk [vmem:[%s2696_s10 + $0x8] sm:$0xff] (!%p1979_p13), %vm574_vm1, %v1739_v9 }
 0x323   : > { %v1596_v3 = vadd.f32 %v1541_v59, %v1435_v38  ;;  %v1629_v0 = vld [vmem:[%s2696_s10 + $0x18] sm:$0xff] (!%p1979_p13)  ;;  %1754 = vst.msk [vmem:[%s2696_s10] sm:$0xff] (!%p1979_p13), %vm574_vm1, %v1738_v63  ;;  %v1691_v59 = vpop.permute.xlu0 (!%p1979_p13), %1690 }
 0x324   : > { %1613 = vst.msk [vmem:[%s2696_s10 + $0x38] sm:$0xff] %vm574_vm1, %v1597_v57  ;;  %v1628_v56 = vld [vmem:[%s2696_s10 + $0x10] sm:$0xff] (!%p1979_p13)  ;;  %v1741_v7 = vmul.f32 (!%p1979_p13), %v1676_v2, %v1629_v0  ;;  %v1696_v57 = vpop.permute.xlu1 (!%p1979_p13), %1695 }
 0x325   : > { %1612 = vst.msk [vmem:[%s2696_s10 + $0x30] sm:$0xff] %vm574_vm1, %v1596_v3  ;;  %v2292_v13 = vpop.f32.mrb[24].mxu1  ;;  %v1740_v62 = vmul.f32 (!%p1979_p13), %v1671_v60, %v1628_v56 }
 0x326   : > { %v1599_v14 = vadd.f32 %v2292_v13, %v1438_v4  ;;  %v1551_v15 = vpop.f32.mrb[25].mxu1  ;;  %1757 = vst.msk [vmem:[%s2696_s10 + $0x18] sm:$0xff] (!%p1979_p13), %vm574_vm1, %v1741_v7 }
 0x327   : > { %v1598_v22 = vadd.f32 %v1551_v15, %v1437_v6  ;;  %1756 = vst.msk [vmem:[%s2696_s10 + $0x10] sm:$0xff] (!%p1979_p13), %vm574_vm1, %v1740_v62  ;;  %v1631_v10 = vld [vmem:[%s2696_s10 + $0x28] sm:$0xff] (!%p1979_p13)  ;;  %v1701_v15 = vpop.permute.xlu0 (!%p1979_p13), %1700 }
 0x328   : > { %1615 = vst.msk [vmem:[%s2696_s10 + $0x48] sm:$0xff] %vm574_vm1, %v1599_v14  ;;  %v1630_v11 = vld [vmem:[%s2696_s10 + $0x20] sm:$0xff] (!%p1979_p13)  ;;  %v1743_v16 = vmul.f32 (!%p1979_p13), %v1686_v12, %v1631_v10  ;;  %v1706_v14 = vpop.permute.xlu1 (!%p1979_p13), %1705 }
 0x329   : > { %1614 = vst.msk [vmem:[%s2696_s10 + $0x40] sm:$0xff] %vm574_vm1, %v1598_v22  ;;  %v2295_v25 = vpop.f32.mrb[26].mxu1  ;;  %v1742_v19 = vmul.f32 (!%p1979_p13), %v1681_v8, %v1630_v11 }
 0x32a   : > { %v1601_v27 = vadd.f32 %v2295_v25, %v1440_v17  ;;  %v1561_v20 = vpop.f32.mrb[27].mxu1  ;;  %1759 = vst.msk [vmem:[%s2696_s10 + $0x28] sm:$0xff] (!%p1979_p13), %vm574_vm1, %v1743_v16 }
 0x32b   : > { %v1600_v21 = vadd.f32 %v1561_v20, %v1439_v18  ;;  %v1633_v38 = vld [vmem:[%s2696_s10 + $0x38] sm:$0xff] (!%p1979_p13)  ;;  %1758 = vst.msk [vmem:[%s2696_s10 + $0x20] sm:$0xff] (!%p1979_p13), %vm574_vm1, %v1742_v19  ;;  %v1711_v20 = vpop.permute.xlu0 (!%p1979_p13), %1710 }
 0x32c   : > { %1617 = vst.msk [vmem:[%s2696_s10 + $0x58] sm:$0xff] %vm574_vm1, %v1601_v27  ;;  %v1632_v42 = vld [vmem:[%s2696_s10 + $0x30] sm:$0xff] (!%p1979_p13)  ;;  %v1745_v3 = vmul.f32 (!%p1979_p13), %v1696_v57, %v1633_v38  ;;  %v1716_v27 = vpop.permute.xlu1 (!%p1979_p13), %1715 }
 0x32d   : > { %1616 = vst.msk [vmem:[%s2696_s10 + $0x50] sm:$0xff] %vm574_vm1, %v1600_v21  ;;  %v2298_v24 = vpop.f32.mrb[28].mxu1  ;;  %v1744_v4 = vmul.f32 (!%p1979_p13), %v1691_v59, %v1632_v42 }
 0x32e   : > { %v1603_v31 = vadd.f32 %v2298_v24, %v1442_v29  ;;  %v1571_v26 = vpop.f32.mrb[29].mxu1  ;;  %1761 = vst.msk [vmem:[%s2696_s10 + $0x38] sm:$0xff] (!%p1979_p13), %vm574_vm1, %v1745_v3 }
 0x32f   : > { %v1602_v33 = vadd.f32 %v1571_v26, %v1441_v23  ;;  %1625 = sbr.rel (%p1979_p13) target bundleno = 922 (0x39a), region = 101  ;;  %v1635_v6 = vld [vmem:[%s2696_s10 + $0x48] sm:$0xff] (!%p1979_p13)  ;;  %1760 = vst.msk [vmem:[%s2696_s10 + $0x30] sm:$0xff] (!%p1979_p13), %vm574_vm1, %v1744_v4  ;;  %v1721_v26 = vpop.permute.xlu0 (!%p1979_p13), %1720 }
 0x330   : > { %1619 = vst.msk [vmem:[%s2696_s10 + $0x68] sm:$0xff] %vm574_vm1, %v1603_v31  ;;  %v1634_v13 = vld [vmem:[%s2696_s10 + $0x40] sm:$0xff] (!%p1979_p13)  ;;  %v1747_v22 = vmul.f32 (!%p1979_p13), %v1706_v14, %v1635_v6  ;;  %v1726_v31 = vpop.permute.xlu1 (!%p1979_p13), %1725 }
 0x331   : > { %1618 = vst.msk [vmem:[%s2696_s10 + $0x60] sm:$0xff] %vm574_vm1, %v1602_v33  ;;  %v2301_v35 = vpop.f32.mrb[30].mxu1  ;;  %v1746_v17 = vmul.f32 (!%p1979_p13), %v1701_v15, %v1634_v13 }
 0x332   : > { %v1605_v32 = vadd.f32 %v2301_v35, %v1444_v28  ;;  %v1581_v37 = vpop.f32.mrb[31].mxu1  ;;  %1763 = vst.msk [vmem:[%s2696_s10 + $0x48] sm:$0xff] (!%p1979_p13), %vm574_vm1, %v1747_v22 }
 0x333   : > { %v1604_v34 = vadd.f32 %v1581_v37, %v1443_v30  ;;  %v1637_v18 = vld [vmem:[%s2696_s10 + $0x58] sm:$0xff] (!%p1979_p13)  ;;  %1762 = vst.msk [vmem:[%s2696_s10 + $0x40] sm:$0xff] (!%p1979_p13), %vm574_vm1, %v1746_v17 }
 0x334   : > { %1621 = vst.msk [vmem:[%s2696_s10 + $0x78] sm:$0xff] %vm574_vm1, %v1605_v32  ;;  %v1636_v25 = vld [vmem:[%s2696_s10 + $0x50] sm:$0xff] (!%p1979_p13)  ;;  %v1749_v21 = vmul.f32 (!%p1979_p13), %v1716_v27, %v1637_v18  ;;  %v1736_v32 = vpop.permute.xlu1 (!%p1979_p13), %1735 }
 0x335   : > { %1620 = vst.msk [vmem:[%s2696_s10 + $0x70] sm:$0xff] %vm574_vm1, %v1604_v34  ;;  %v1748_v29 = vmul.f32 (!%p1979_p13), %v1711_v20, %v1636_v25 }
 0x336   : > { %1765 = vst.msk [vmem:[%s2696_s10 + $0x58] sm:$0xff] %vm574_vm1, %v1749_v21 }
 0x337   : > { %v1639_v23 = vld [vmem:[%s2696_s10 + $0x68] sm:$0xff]  ;;  %1764 = vst.msk [vmem:[%s2696_s10 + $0x50] sm:$0xff] %vm574_vm1, %v1748_v29 }
 0x338   : > { %v1638_v24 = vld [vmem:[%s2696_s10 + $0x60] sm:$0xff]  ;;  %v1751_v33 = vmul.f32 %v1726_v31, %v1639_v23 }
 0x339   : > { %v1750_v28 = vmul.f32 %v1721_v26, %v1638_v24 }
 0x33a   : > { %1767 = vst.msk [vmem:[%s2696_s10 + $0x68] sm:$0xff] %vm574_vm1, %v1751_v33 }
 0x33b   : > { %v1641_v30 = vld [vmem:[%s2696_s10 + $0x78] sm:$0xff]  ;;  %1766 = vst.msk [vmem:[%s2696_s10 + $0x60] sm:$0xff] %vm574_vm1, %v1750_v28 }
 0x33c   : > { %v1640_v35 = vld [vmem:[%s2696_s10 + $0x70] sm:$0xff]  ;;  %v1753_v34 = vmul.f32 %v1736_v32, %v1641_v30 }
 0x33e   : > { %1769 = vst.msk [vmem:[%s2696_s10 + $0x78] sm:$0xff] %vm574_vm1, %v1753_v34 }
 0x396   : > { %v1731_v37 = vpop.permute.xlu0 %1730 }
 0x397   : > { %v1752_v36 = vmul.f32 %v1731_v37, %v1640_v35 }
 0x399   : > { %1768 = vst.msk [vmem:[%s2696_s10 + $0x70] sm:$0xff] %vm574_vm1, %v1752_v36 }
 0x39a PF: > { %s20_s7 = sadd.s32 1, %s2547_s7   ;;  %s3176_s29 = smov %s2527_s30 }
 0x39b   : > { %p17_p0 = scmp.ge.s32.totalorder %s20_s7, 6   ;;  %s3177_s30 = smov %s2651_s18 }
 0x39c   : > { %s3178_s9 = smov %s2539_s11  ;;  %s3179_s10 = smov %s2543_s12 }
 0x39d   : > { %s3180_s11 = smov %s3183_s6  ;;  %s3181_s12 = smov %s3187_s13 }
 0x39e   :  { %19 = sbr.rel (!%p17_p0) target bundleno = 7 (0x7), region = 148 }

</bundles_post_ra>
